<compile_context>
chip_gen: v5e
topology: v5e:2x2
jax: 0.10.0
libtpu: 0.0.40
codegen_flags: <defaults>
</compile_context>

<pallas_src>
import functools

import jax
import jax.numpy as jnp
from jax import lax
from jax.experimental import pallas as pl
from jax.experimental.pallas import tpu as pltpu


def _round_up(x, m):
    return ((x + m - 1) // m) * m


def _fp32_layernorm_kernel(*refs, eps, inv_dim, chunk_rows, n_chunks, use_mxu):
    # refs: x [block_rows, dim] (native dtype), [red [dim,128] bf16 ones if use_mxu],
    #       w [1, dim] f32, b [1, dim] f32, out [block_rows, dim] (native dtype).
    if use_mxu:
        x_ref, red_ref, w_ref, b_ref, o_ref = refs
        red = red_ref[...]                       # (dim, 128) ones, bf16 (exact)
    else:
        x_ref, w_ref, b_ref, o_ref = refs
        red = None

    # TODO(synk): weight/bias are consumed as (1, dim) sublane-broadcast operands;
    # an (8, dim) replicated layout is a possible small further win on v7x.
    w = w_ref[...]                               # (1, dim) f32
    b = b_ref[...]                               # (1, dim) f32

    def process(c, carry):
        r0 = c * chunk_rows
        if not isinstance(r0, int):
            r0 = pl.multiple_of(r0, chunk_rows)
        rows = pl.ds(r0, chunk_rows)

        x_nat = x_ref[rows, :]                   # native dtype chunk
        x = x_nat.astype(jnp.float32)

        # Pass 1: mean.  bf16 elements summed with f32 accumulation on the MXU are
        # exactly the fp32 sum of the upcast values.
        if use_mxu:
            s = jnp.dot(x_nat, red, preferred_element_type=jnp.float32)[:, 0:1]
        else:
            s = jnp.sum(x, axis=-1, keepdims=True)
        mean = s * inv_dim
        xc = x - mean

        # Pass 2: variance = E[(x - mean)^2]  (two-pass: no cancellation).
        if use_mxu:
            # bf16-rounded squares summed in f32 on the MXU; error << bf16 output ulp.
            sq = (xc * xc).astype(jnp.bfloat16)
            ss = jnp.dot(sq, red, preferred_element_type=jnp.float32)[:, 0:1]
        else:
            ss = jnp.sum(xc * xc, axis=-1, keepdims=True)
        var = jnp.maximum(ss * inv_dim, 0.0)

        inv = lax.rsqrt(var + eps)               # EUP slot
        y = xc * inv * w + b
        o_ref[rows, :] = y.astype(o_ref.dtype)
        return carry

    if n_chunks == 1:
        process(0, 0)
    else:
        lax.fori_loop(0, n_chunks, process, 0)


def _tpu_vmem_capacity_bytes():
    try:
        return int(pltpu.get_tpu_info().vmem_capacity_bytes)
    except Exception:
        return 64 * 1024 * 1024        # conservative fallback (v7x per-TC VMEM)


def _pick_block_config(n_rows, dim, itemsize, use_mxu):
    # Sublane packing multiple for the native dtype: fp32->8, bf16->16, int8/fp8->32.
    row_multiple = max(8, 32 // max(itemsize, 1))
    n_rows_padded = _round_up(n_rows, row_multiple)

    vmem_cap = _tpu_vmem_capacity_bytes()
    small_vmem = vmem_cap <= 96 * 1024 * 1024       # v7x-like: 64 MiB/TC, 2 TCs/chip
    vmem_limit = int(min(vmem_cap * 0.75, 100 * 1024 * 1024))

    # Compute sub-chunk: keeps the live fp32 temps small so the streamed block can grow.
    chunk_rows = 128 if small_vmem else 256
    chunk_rows = min(chunk_rows, n_rows_padded)
    chunk_rows = _round_up(chunk_rows, row_multiple)

    # ~4 live fp32 chunk-sized temps + (double-buffered) bf16 reduce matrix + slack.
    temp_bytes = 4 * chunk_rows * dim * 4
    if use_mxu:
        temp_bytes += dim * 128 * 2 * 2
    temp_bytes += 1 << 20

    block_budget = int(vmem_cap * 0.55)
    bytes_per_block_row = 4 * dim * itemsize        # double-buffered in + out blocks
    stream_budget = max(block_budget - temp_bytes, bytes_per_block_row * chunk_rows)
    block_rows = stream_budget // max(bytes_per_block_row, 1)

    if small_vmem:
        # Keep >= 2 grid steps so the "parallel" axis can shard across 2 TensorCores.
        block_rows = min(block_rows, pl.cdiv(n_rows, 2))
    block_rows = min(block_rows, n_rows_padded, 4096)
    block_rows = max(block_rows, chunk_rows)
    block_rows = (block_rows // chunk_rows) * chunk_rows
    n_chunks = block_rows // chunk_rows
    return int(block_rows), int(chunk_rows), int(n_chunks), int(vmem_limit)


def fp32_layer_norm(x, weight, bias, eps=1e-6):
    """LayerNorm over the last dim of x, computed in fp32, cast back to x.dtype."""
    orig_shape = x.shape
    orig_dtype = x.dtype
    dim = orig_shape[-1]

    x2 = x.reshape(-1, dim)               # flatten leading dims; dim stays on lanes
    n_rows = x2.shape[0]
    itemsize = jnp.dtype(orig_dtype).itemsize

    # MXU reduction offload only where it is numerically safe vs. the fp32 reference:
    # bf16 inputs (mean is exact; variance error is far below bf16 output resolution).
    use_mxu = (orig_dtype == jnp.bfloat16)

    block_rows, chunk_rows, n_chunks, vmem_limit = _pick_block_config(
        n_rows, dim, itemsize, use_mxu)

    w2 = weight.astype(jnp.float32).reshape(1, dim)
    b2 = bias.astype(jnp.float32).reshape(1, dim)

    grid = (pl.cdiv(n_rows, block_rows),)    # partial last block handled by Pallas

    # TODO(synk): for dim not a multiple of 128 the stores are lane-masked; a one-time
    # lane-padding of x/weight/bias would make them dense at the cost of an extra HBM
    # copy of x. Standard hidden sizes (1024/4096/8192) take the dense path as-is.

    in_specs = [pl.BlockSpec((block_rows, dim), lambda i: (i, 0))]
    operands = [x2]
    if use_mxu:
        red = jnp.ones((dim, 128), dtype=jnp.bfloat16)
        in_specs.append(pl.BlockSpec((dim, 128), lambda i: (0, 0)))   # grid-resident
        operands.append(red)
    in_specs += [pl.BlockSpec((1, dim), lambda i: (0, 0)),
                 pl.BlockSpec((1, dim), lambda i: (0, 0))]
    operands += [w2, b2]

    mxu_flops = 2 * 2 * n_rows * dim * 128 if use_mxu else 0
    cost = pl.CostEstimate(
        flops=int(8 * n_rows * dim + mxu_flops),
        transcendentals=int(n_rows),
        bytes_accessed=int(2 * n_rows * dim * itemsize + 2 * dim * 4),
    )

    out = pl.pallas_call(
        functools.partial(_fp32_layernorm_kernel, eps=float(eps), inv_dim=1.0 / dim,
                          chunk_rows=chunk_rows, n_chunks=n_chunks, use_mxu=use_mxu),
        out_shape=jax.ShapeDtypeStruct((n_rows, dim), orig_dtype),
        grid_spec=pltpu.PrefetchScalarGridSpec(
            num_scalar_prefetch=0,
            grid=grid,
            in_specs=in_specs,
            out_specs=pl.BlockSpec((block_rows, dim), lambda i: (i, 0)),
        ),
        compiler_params=pltpu.CompilerParams(
            dimension_semantics=("parallel",),
            vmem_limit_bytes=vmem_limit,
        ),
        cost_estimate=cost,
    )(*operands)

    return out.reshape(orig_shape)


class FP32LayerNorm:
    """JAX mirror of the PyTorch FP32LayerNorm module."""

    def __init__(self, dim: int, eps: float = 1e-6, sequence_parallel: bool = False, **kwargs):
        self.dim = dim
        self.eps = eps
        # Deterministic init, exactly as the nn.Module __init__: ones / zeros (fp32).
        self.weight = jnp.ones((dim,), dtype=jnp.float32)
        self.bias = jnp.zeros((dim,), dtype=jnp.float32)
        # TODO(synk): sequence_parallel only tags params for distributed training;
        # no kernel-level equivalent.
        self.sequence_parallel = sequence_parallel

    def __call__(self, x):
        return fp32_layer_norm(x, self.weight, self.bias, self.eps)


def _reference(x, weight, bias, eps):
    xf = x.astype(jnp.float32)
    mean = jnp.mean(xf, axis=-1, keepdims=True)
    var = jnp.mean((xf - mean) ** 2, axis=-1, keepdims=True)
    return ((xf - mean) * lax.rsqrt(var + eps) * weight + bias).astype(x.dtype)


if __name__ == "__main__":
    key = jax.random.PRNGKey(0)
    ok = True
    batch, seq, hidden = 2, 8, 32
    ln = FP32LayerNorm(hidden, eps=1e-6)

    # Test 1: bf16 input (MXU-offloaded reductions, fp32 compute, cast-back).
    x = jax.random.normal(key, (batch, seq, hidden), dtype=jnp.float32).astype(jnp.bfloat16)
    y = jax.block_until_ready(ln(x))
    ref = _reference(x, ln.weight, ln.bias, 1e-6)
    ok &= (y.shape == x.shape and y.dtype == x.dtype)
    ok &= bool(jnp.allclose(y.astype(jnp.float32), ref.astype(jnp.float32), atol=1e-2, rtol=1e-2))

    # Test 2: fp32 input, row count not a multiple of the block (masked last block, VALU path).
    x2 = jax.random.normal(jax.random.PRNGKey(1), (3, 5, hidden), dtype=jnp.float32)
    y2 = jax.block_until_ready(ln(x2))
    ref2 = _reference(x2, ln.weight, ln.bias, 1e-6)
    ok &= (y2.shape == x2.shape and y2.dtype == x2.dtype)
    ok &= bool(jnp.allclose(y2, ref2, atol=1e-4, rtol=1e-4))

    # Test 3: bf16 input with a partial last block (MXU path + row masking together).
    x3 = jax.random.normal(jax.random.PRNGKey(2), (3, 5, hidden), dtype=jnp.float32).astype(jnp.bfloat16)
    y3 = jax.block_until_ready(ln(x3))
    ref3 = _reference(x3, ln.weight, ln.bias, 1e-6)
    ok &= (y3.shape == x3.shape and y3.dtype == x3.dtype)
    ok &= bool(jnp.allclose(y3.astype(jnp.float32), ref3.astype(jnp.float32), atol=1e-2, rtol=1e-2))

    assert ok
    print("KERNEL_OK")
</pallas_src>

<mosaic_0001>
module attributes {stable_mosaic.version = 11 : i64} {
  func.func @_fp32_layernorm_kernel(%arg0: i32, %arg1: memref<16x32xbf16, #tpu.memory_space<vmem>>, %arg2: memref<32x128xbf16, #tpu.memory_space<vmem>>, %arg3: memref<1x32xf32, #tpu.memory_space<vmem>>, %arg4: memref<1x32xf32, #tpu.memory_space<vmem>>, %arg5: memref<16x32xbf16, #tpu.memory_space<vmem>>) attributes {dimension_semantics = [#tpu.dimension_semantics<parallel>], iteration_bounds = array<i64: 1>, scalar_prefetch = 0 : i64, scratch_operands = 0 : i64, tpu.core_type = #tpu.core_type<tc>, window_params = [{transform_indices = @transform_0, window_bounds = array<i64: 16, 32>}, {pipeline_mode = #tpu.pipeline_mode<synchronous>, transform_indices = @transform_1, window_bounds = array<i64: 32, 128>}, {pipeline_mode = #tpu.pipeline_mode<synchronous>, transform_indices = @transform_2, window_bounds = array<i64: 1, 32>}, {pipeline_mode = #tpu.pipeline_mode<synchronous>, transform_indices = @transform_3, window_bounds = array<i64: 1, 32>}, {transform_indices = @transform_4, window_bounds = array<i64: 16, 32>}]} {
    %c0 = arith.constant 0 : index
    %c0_0 = arith.constant 0 : index
    %0 = vector.load %arg2[%c0, %c0_0] : memref<32x128xbf16, #tpu.memory_space<vmem>>, vector<32x128xbf16>
    %c0_1 = arith.constant 0 : index
    %c0_2 = arith.constant 0 : index
    %1 = vector.load %arg3[%c0_1, %c0_2] : memref<1x32xf32, #tpu.memory_space<vmem>>, vector<1x32xf32>
    %c0_3 = arith.constant 0 : index
    %c0_4 = arith.constant 0 : index
    %2 = vector.load %arg4[%c0_3, %c0_4] : memref<1x32xf32, #tpu.memory_space<vmem>>, vector<1x32xf32>
    %c0_5 = arith.constant 0 : index
    %c0_6 = arith.constant 0 : index
    %3 = vector.load %arg1[%c0_5, %c0_6] : memref<16x32xbf16, #tpu.memory_space<vmem>>, vector<16x32xbf16>
    %4 = arith.extf %3 : vector<16x32xbf16> to vector<16x32xf32>
    %cst = arith.constant dense<0.000000e+00> : vector<16x128xf32>
    %5 = tpu.matmul %3, %0, %cst {dimension_numbers = #tpu.dot_dimension_numbers<[1], [0], [0], [1], [0, 0, 1, 1], [], []>} : vector<16x32xbf16>, vector<32x128xbf16>, vector<16x128xf32> -> vector<16x128xf32>
    %6 = vector.extract_strided_slice %5 {offsets = [0, 0], sizes = [16, 1], strides = [1, 1]} : vector<16x128xf32> to vector<16x1xf32>
    %cst_7 = arith.constant 3.125000e-02 : f32
    %7 = vector.broadcast %cst_7 : f32 to vector<16x1xf32>
    %8 = arith.mulf %6, %7 : vector<16x1xf32>
    %9 = vector.broadcast %8 : vector<16x1xf32> to vector<16x32xf32>
    %10 = arith.subf %4, %9 : vector<16x32xf32>
    %11 = arith.mulf %10, %10 : vector<16x32xf32>
    %12 = arith.truncf %11 : vector<16x32xf32> to vector<16x32xbf16>
    %cst_8 = arith.constant dense<0.000000e+00> : vector<16x128xf32>
    %13 = tpu.matmul %12, %0, %cst_8 {dimension_numbers = #tpu.dot_dimension_numbers<[1], [0], [0], [1], [0, 0, 1, 1], [], []>} : vector<16x32xbf16>, vector<32x128xbf16>, vector<16x128xf32> -> vector<16x128xf32>
    %14 = vector.extract_strided_slice %13 {offsets = [0, 0], sizes = [16, 1], strides = [1, 1]} : vector<16x128xf32> to vector<16x1xf32>
    %cst_9 = arith.constant 3.125000e-02 : f32
    %15 = vector.broadcast %cst_9 : f32 to vector<16x1xf32>
    %16 = arith.mulf %14, %15 : vector<16x1xf32>
    %cst_10 = arith.constant 0.000000e+00 : f32
    %17 = vector.broadcast %cst_10 : f32 to vector<16x1xf32>
    %18 = arith.maximumf %16, %17 : vector<16x1xf32>
    %cst_11 = arith.constant 9.99999997E-7 : f32
    %19 = vector.broadcast %cst_11 : f32 to vector<16x1xf32>
    %20 = arith.addf %18, %19 : vector<16x1xf32>
    %21 = math.rsqrt %20 : vector<16x1xf32>
    %22 = vector.broadcast %21 : vector<16x1xf32> to vector<16x32xf32>
    %23 = arith.mulf %10, %22 : vector<16x32xf32>
    %24 = vector.broadcast %1 : vector<1x32xf32> to vector<16x32xf32>
    %25 = arith.mulf %23, %24 : vector<16x32xf32>
    %26 = vector.broadcast %2 : vector<1x32xf32> to vector<16x32xf32>
    %27 = arith.addf %25, %26 : vector<16x32xf32>
    %28 = arith.truncf %27 : vector<16x32xf32> to vector<16x32xbf16>
    %c0_12 = arith.constant 0 : index
    %c0_13 = arith.constant 0 : index
    %29 = vector.load %arg5[%c0_12, %c0_13] : memref<16x32xbf16, #tpu.memory_space<vmem>>, vector<16x32xbf16>
    tpu.vector_store %arg5[%c0_12, %c0_13], %28 {strides = array<i32>} : memref<16x32xbf16, #tpu.memory_space<vmem>>, vector<16x32xbf16>,
    return
  }
  func.func @transform_0(%arg0: i32) -> (i32, i32) {
    %c0_i32 = arith.constant 0 : i32
    %c0_i32_0 = arith.constant 0 : i32
    return %arg0, %c0_i32 : i32, i32
  }
  func.func @transform_1(%arg0: i32) -> (i32, i32) {
    %c0_i32 = arith.constant 0 : i32
    %c0_i32_0 = arith.constant 0 : i32
    %c0_i32_1 = arith.constant 0 : i32
    return %c0_i32, %c0_i32_0 : i32, i32
  }
  func.func @transform_2(%arg0: i32) -> (i32, i32) {
    %c0_i32 = arith.constant 0 : i32
    %c0_i32_0 = arith.constant 0 : i32
    %c0_i32_1 = arith.constant 0 : i32
    return %c0_i32, %c0_i32_0 : i32, i32
  }
  func.func @transform_3(%arg0: i32) -> (i32, i32) {
    %c0_i32 = arith.constant 0 : i32
    %c0_i32_0 = arith.constant 0 : i32
    %c0_i32_1 = arith.constant 0 : i32
    return %c0_i32, %c0_i32_0 : i32, i32
  }
  func.func @transform_4(%arg0: i32) -> (i32, i32) {
    %c0_i32 = arith.constant 0 : i32
    %c0_i32_0 = arith.constant 0 : i32
    return %arg0, %c0_i32 : i32, i32
  }
}

</mosaic_0001>

<bundles_post_ra>
// kernel: tpu_custom_call.1
= control target key start
LH: loop header
LB: loop body
LE: loop exit
PB: predicated region body
PF: predicated region fallthrough
CT: control target
= control target key end

     0   :  { %9 = vsyncpa [#allocation3], 0  ;;  %s369_s0 = inlined_call_operand.hbm [shape: bf16[16,32], index: 0, kind: input, shape index: {}]   ;;  %s370_s1 = inlined_call_operand.hbm [shape: bf16[32,128], index: 1, kind: input, shape index: {}]   ;;  %s371_s2 = inlined_call_operand.vmem [shape: f32[1,32], index: 2, kind: input, shape index: {}]   ;;  %s372_s3 = inlined_call_operand.vmem [shape: f32[1,32], index: 3, kind: input, shape index: {}]   ;;  %s373_s4 = inlined_call_operand.hbm [shape: bf16[16,32], index: 4, kind: output, shape index: {}]  }
   0x1   :  { %10 = vsyncpa [#allocation6], 0 }
   0x2   :  { %11 = vsyncpa [#allocation4], 0  ;;  %s16_s17 = sshll.u32 %s369_s0, 4  ;;  %s312_s18 = smov [#allocation2]   ;;  %s17_s17 = int_to_ptr.hbm [resolvable:$true] %s16_s17 }
   0x3   :  { %s18_s19 = sshll.u32 %s312_s18, 4  ;;  %s29_s22 = sshll.u32 %s370_s1, 4  ;;  %s19_s19 = int_to_ptr.vmem [resolvable:$true] %s18_s19  ;;  %s30_s22 = int_to_ptr.hbm [resolvable:$true] %s29_s22 }
   0x4   :  { %s313_s23 = smov 64   ;;  %s314_s24 = smov 4  }
   0x5   :  { %24 = dma.hbm_to_vmem [thread:$0]  %s17_s17, 128, %s19_s19, [#allocation3], %s313_s23, %s313_s23, %s314_s24  }
   0x6   :  { %s315_s25 = smov [#allocation5]  }
   0x7   :  { %s31_s26 = sshll.u32 %s315_s25, 4  ;;  %s32_s26 = int_to_ptr.vmem [resolvable:$true] %s31_s26 }
   0x8   :  { %37 = dma.hbm_to_vmem [thread:$0]  %s30_s22, 256, %s32_s26, [#allocation6], %s313_s23, %s313_s23, %s314_s24  }
   0x9   :  { %306 = dma.done.wait [#allocation3], 128  }
   0xa   :  { %307 = vsyncadd [#allocation3], 4294967168 }
   0xb   :  { %308 = dma.done.wait [#allocation6], 256  }
   0xc   :  { %309 = vsyncadd [#allocation6], 4294967040  ;;  %v218_v0 = vld [vmem:[#allocation5 + $0x8] sm:$0xff]  ;;  %v217_v1 = vld [vmem:[#allocation5] sm:$0xff]  ;;  %vm78_vm0 = vcmask 261120   ;;  %v316_v3 = vmov 0  }
   0xd   :  { %88 = vmatpush.bf16.msra.mxu0 %v218_v0  ;;  %122 = vmatpush.bf16.msra.mxu1 %v218_v0  ;;  %v219_v2 = vld [vmem:[#allocation2] sm:$0xff]  ;;  %vm180_vm7 = vcmask 257024   ;;  %s317_s29 = smov [#allocation7]  }
   0xe   :  { %226 = vset.pattern.permute.xlu0 %v316_v3  ;;  %227 = vset.pattern.permute.xlu1 %v316_v3  ;;  %v57_v8 = vld [vmem:[#allocation2] sm:$0xff]   ;;  %s187_s30 = sshll.u32 %s317_s29, 4  ;;  %s188_s30 = int_to_ptr.vmem [resolvable:$true] %s187_s30 }
   0xf   :  { %v59_v10 = vunpack.c.l.bf16 %v57_v8  ;;  %v60_v11 = vunpack.c.h.bf16 %v57_v8  ;;  %v228_v40 = vld [vmem:[%s371_s2] ss:$0 sm:$0xff]  ;;  %s189_s2 = sshll.u32 %s373_s4, 4  ;;  %s190_s2 = int_to_ptr.hbm [resolvable:$true] %s189_s2 }
  0x10   :  { %v229_v42 = vld [vmem:[%s372_s3] ss:$0 sm:$0xff] }
  0x11   :  { %89 = vmatpush.bf16.msra.mxu0 %v217_v1  ;;  %123 = vmatpush.bf16.msra.mxu1 %v217_v1 }
  0x14   :  { %215 = vmatmul.msk.bf16.vlgmr.msra.gmra.mxu0 %vm78_vm0, %v219_v2 }
  0x91   :  { %v91_v4 = vpop.f32.mrf.mxu0 }
  0x92   :  { %v96_v5 = vmul.f32 0.03125, %v91_v4 }
  0x94   :  { %100 = vperm.xlu0 %226, %v96_v5  }
  0x99   :  { %v93_v6 = vpop.f32.mrf.mxu0 }
  0x9a   :  { %v97_v7 = vmul.f32 0.03125, %v93_v6 }
  0x9c   :  { %105 = vperm.xlu0 %226, %v97_v7  }
 0x106   :  { %v101_v9 = vpop.permute.xlu0 %100 }
 0x107   :  { %v108_v12 = vsub.f32 %v59_v10, %v101_v9 }
 0x109   :  { %v110_v15 = vmul.f32 %v108_v12, %v108_v12 }
 0x10e   :  { %v106_v13 = vpop.permute.xlu0 %105 }
 0x10f   :  { %v109_v14 = vsub.f32 %v60_v11, %v106_v13 }
 0x111   :  { %v111_v16 = vmul.f32 %v109_v14, %v109_v14 }
 0x113   :  { %v112_v17 = vpack.c.bf16 %v111_v16, %v110_v15 }
 0x115   :  { %216 = vmatmul.msk.bf16.vlgmr.msra.gmra.mxu1 %vm78_vm0, %v112_v17 }
 0x192   :  { %v125_v18 = vpop.f32.mrf.mxu1 }
 0x193   :  { %v130_v19 = vmul.f32 0.03125, %v125_v18 }
 0x195   :  { %v132_v20 = vmax.f32 %v130_v19, 0.0 }
 0x197   :  { %v134_v21 = vadd.f32 1e-06, %v132_v20 }
 0x199   :  { %230 = vrsqrt.f32 %v134_v21  ;;  %vm142_vm2 = vweird.f32 %v134_v21 }
 0x19a   :  { %v127_v22 = vpop.f32.mrf.mxu1 }
 0x19b   :  { %v131_v23 = vmul.f32 0.03125, %v127_v22 }
 0x19d   :  { %v133_v24 = vmax.f32 %v131_v23, 0.0 }
 0x19f   :  { %v231_v25 = vpop.eup %230  ;;  %v135_v26 = vadd.f32 1e-06, %v133_v24 }
 0x1a0   :  { %v137_v27 = vmul.f32 %v231_v25, %v134_v21  ;;  %vm143_vm1 = vweird.f32 %v231_v25 }
 0x1a1   :  { %232 = vrsqrt.f32 %v135_v26  ;;  %vm144_vm3 = vmor %vm142_vm2, %vm143_vm1  ;;  %vm152_vm5 = vweird.f32 %v135_v26 }
 0x1a2   :  { %v138_v28 = vmul.f32 %v231_v25, %v137_v27 }
 0x1a4   :  { %v139_v29 = vmul.f32 0.5, %v138_v28 }
 0x1a6   :  { %v140_v30 = vsub.f32 1.5, %v139_v29 }
 0x1a7   :  { %v233_v31 = vpop.eup %232 }
 0x1a8   :  { %v147_v32 = vmul.f32 %v233_v31, %v135_v26  ;;  %v141_v33 = vmul.f32 %v231_v25, %v140_v30  ;;  %vm153_vm4 = vweird.f32 %v233_v31 }
 0x1a9   :  { %vm154_vm6 = vmor %vm152_vm5, %vm153_vm4 }
 0x1aa   :  { %v148_v34 = vmul.f32 %v233_v31, %v147_v32  ;;  %v145_v35 = vsel %vm144_vm3, %v231_v25, %v141_v33 }
 0x1ab   :  { %158 = vperm.xlu1 %227, %v145_v35  }
 0x1ac   :  { %v149_v36 = vmul.f32 0.5, %v148_v34 }
 0x1ae   :  { %v150_v37 = vsub.f32 1.5, %v149_v36 }
 0x1b0   :  { %v151_v38 = vmul.f32 %v233_v31, %v150_v37 }
 0x1b2   :  { %v155_v39 = vsel %vm154_vm6, %v233_v31, %v151_v38 }
 0x1b3   :  { %163 = vperm.xlu1 %227, %v155_v39  }
 0x21d   :  { %v159_v41 = vpop.permute.xlu1 %158 }
 0x21e   :  { %v166_v43 = vmul.f32 %v159_v41, %v108_v12 }
 0x220   :  { %v171_v44 = vmul.f32 %v228_v40, %v166_v43 }
 0x222   :  { %v176_v45 = vadd.f32 %v229_v42, %v171_v44 }
 0x224   :  { %v178_v46 = vpack.c.bf16 %v176_v45, %v176_v45 }
 0x225   :  { %v164_v47 = vpop.permute.xlu1 %163 }
 0x226   :  { %v167_v48 = vmul.f32 %v164_v47, %v109_v14  ;;  %181 = vst.msk [vmem:[#allocation7] sm:$0xf] %vm180_vm7, %v178_v46 }
 0x228   :  { %v172_v49 = vmul.f32 %v228_v40, %v167_v48 }
 0x22a   :  { %v177_v50 = vadd.f32 %v229_v42, %v172_v49 }
 0x22c   :  { %v179_v51 = vpack.c.bf16 %v177_v50, %v177_v50 }
 0x22e   :  { %182 = vst.msk [vmem:[#allocation7 + $0x4] sm:$0xf] %vm180_vm7, %v179_v51 }
 0x22f   :  { %195 = dma.vmem_to_hbm [thread:$0]  %s188_s30, 128, %s190_s2, [#allocation4], %s313_s23, %s313_s23, %s314_s24  }
 0x230   :  { %310 = dma.done.wait [#allocation4], 128  }
 0x231   :  { %311 = vsyncadd [#allocation4], 4294967168 }
 0x232   :  { %200 = vsyncpa [#allocation3], 1 }
 0x233   :  { %201 = vsyncpa [#allocation6], 1 }
 0x234   :  { %202 = vsyncpa [#allocation4], 1 }

</bundles_post_ra>
